<compile_context>
chip_gen: v7x
topology: tpu7x:2x2x1
jax: 0.10.0
libtpu: 0.0.40
codegen_flags: <defaults>
</compile_context>

<pallas_src>
import functools

import jax
import jax.numpy as jnp
from jax.experimental import pallas as pl
from jax.experimental.pallas import tpu as pltpu


def _round_up(x, m):
    return ((x + m - 1) // m) * m


def _conv_implicit_gemm_kernel(w_ref, x_ref, o_ref, acc_ref, *,
                               KH, KW, W_eff, M_blk, negative_slope):
    # w_ref:   (KH*KW, Cout_pad, Cin)  resident weight (compute dtype)
    # x_ref:   (1, Cin, S_pad)         one image, spatial flattened as h*W_eff + w
    # o_ref:   (1, Cout_pad, M_blk)    lane-dense output block (M_blk % 128 == 0)
    # acc_ref: (Cout_pad, M_blk)       f32 accumulator scratch
    x = x_ref[0]                                   # (Cin, S_pad)
    acc_ref[...] = jnp.zeros_like(acc_ref)
    for kh in range(KH):
        for kw in range(KW):
            d = kh * W_eff + kw                    # static shift: implicit im2col
            xs = x[:, d:d + M_blk]                 # (Cin, M_blk), stays in VMEM/vregs
            acc_ref[...] += jnp.dot(w_ref[kh * KW + kw], xs,
                                    preferred_element_type=jnp.float32)
    acc = acc_ref[...]
    acc = jnp.where(acc > 0.0, acc, negative_slope * acc)    # LeakyReLU in f32
    o_ref[0] = acc.astype(o_ref.dtype)


def conv2d_leakyrelu(x_nchw, weight_oihw, *, stride=1, padding="valid",
                     negative_slope=0.01, compute_dtype=jnp.bfloat16,
                     out_dtype=None):
    """Conv2d (valid or integer zero padding, no bias) fused with LeakyReLU.

    compute_dtype=jnp.bfloat16 by default (explicit opt-in flag: pass jnp.float32
    for exact f32 parity).  Accumulation is always f32.
    """
    N, Cin, H, W = x_nchw.shape
    Cout, Cin_w, KH, KW = weight_oihw.shape
    assert Cin == Cin_w
    out_dtype = x_nchw.dtype if out_dtype is None else out_dtype

    if padding == "valid":
        pad = 0
    elif isinstance(padding, int):
        pad = padding
    else:
        raise NotImplementedError("only padding='valid' or an int are supported")

    # Cast EARLY (before any padding / reshaping) so all wrapper glue is half-width.
    x = x_nchw.astype(compute_dtype)
    if pad:
        x = jnp.pad(x, ((0, 0), (0, 0), (pad, pad), (pad, pad)))
    H_eff, W_eff = H + 2 * pad, W + 2 * pad
    assert H_eff >= KH and W_eff >= KW

    # Stride handled by computing the dense stride-1 grid and subsampling.
    # TODO(synk): stride > 1 computes stride^2 more positions than strictly needed.
    Ho_full, Wo_full = H_eff - KH + 1, W_eff - KW + 1
    Ho = (H_eff - KH) // stride + 1
    Wo = (W_eff - KW) // stride + 1

    lane = 128
    Cout_pad = _round_up(Cout, 8)
    M_blk = _round_up(Ho_full * W_eff, lane)        # lane-dense output width per image
    halo = (KH - 1) * W_eff + (KW - 1)
    S_pad = M_blk + halo                            # flattened input incl. shift halo

    # ---- glue: reshape + pad only (no transpose, no im2col, already compute dtype) --
    x_flat = x.reshape(N, Cin, H_eff * W_eff)
    x_flat = jnp.pad(x_flat, ((0, 0), (0, 0), (0, S_pad - H_eff * W_eff)))

    # weight (Cout, Cin, KH, KW) -> (KH*KW, Cout_pad, Cin)
    w_k = jnp.transpose(weight_oihw.astype(compute_dtype), (2, 3, 0, 1))
    w_k = w_k.reshape(KH * KW, Cout, Cin)
    w_k = jnp.pad(w_k, ((0, 0), (0, Cout_pad - Cout), (0, 0)))

    # ---- VMEM budget derived from the chip; counts BOTH pipeline buffers ----
    cmp_bytes = jnp.dtype(compute_dtype).itemsize
    out_bytes = jnp.dtype(out_dtype).itemsize
    x_blk = Cin * S_pad * cmp_bytes
    o_blk = Cout_pad * M_blk * out_bytes
    w_blk = KH * KW * Cout_pad * Cin * cmp_bytes
    acc_blk = Cout_pad * M_blk * 4
    vmem_need = 2 * (x_blk + o_blk + w_blk) + acc_blk   # weight's 2nd buffer counted too
    try:
        vmem_cap = int(pltpu.get_tpu_info().vmem_capacity_bytes)
    except Exception:                                   # pragma: no cover
        vmem_cap = 64 * 1024 * 1024                     # conservative (v7x per-core)
    vmem_limit = int(min(max(32 * 1024 * 1024, 2 * vmem_need + (4 << 20)),
                         int(0.9 * vmem_cap)))

    cost = pl.CostEstimate(
        flops=2 * N * M_blk * KH * KW * Cin * Cout_pad,
        transcendentals=0,
        bytes_accessed=(N * Cin * S_pad * cmp_bytes
                        + KH * KW * Cout_pad * Cin * cmp_bytes
                        + N * Cout_pad * M_blk * out_bytes),
    )

    kernel = functools.partial(
        _conv_implicit_gemm_kernel,
        KH=KH, KW=KW, W_eff=W_eff, M_blk=M_blk, negative_slope=negative_slope)

    out = pl.pallas_call(
        kernel,
        out_shape=jax.ShapeDtypeStruct((N, Cout_pad, M_blk), out_dtype),
        grid_spec=pltpu.PrefetchScalarGridSpec(
            num_scalar_prefetch=0,
            grid=(N,),
            in_specs=[
                pl.BlockSpec((KH * KW, Cout_pad, Cin), lambda n: (0, 0, 0)),  # weight
                pl.BlockSpec((1, Cin, S_pad), lambda n: (n, 0, 0)),           # image n
            ],
            out_specs=pl.BlockSpec((1, Cout_pad, M_blk), lambda n: (n, 0, 0)),
            scratch_shapes=[pltpu.VMEM((Cout_pad, M_blk), jnp.float32)],
        ),
        compiler_params=pltpu.CompilerParams(
            dimension_semantics=("parallel",),   # images shard across v7x TensorCores
            vmem_limit_bytes=vmem_limit,
        ),
        cost_estimate=cost,
    )(w_k, x_flat)

    # (N, Cout_pad, M_blk) -> (N, Cout, Ho, Wo): slice + reshape only, no transpose.
    out = out[:, :Cout, :Ho_full * W_eff].reshape(N, Cout, Ho_full, W_eff)
    out = out[:, :, :, :Wo_full]
    if stride > 1:
        out = out[:, :, ::stride, ::stride]
    assert out.shape == (N, Cout, Ho, Wo)
    return out


if __name__ == "__main__":
    # module config: in_channels=4, out_channels=8, kernel_size=3,
    #                stride=1, padding='valid', bias=False, LeakyReLU(0.01)
    N, Cin, H, W = 2, 4, 16, 16
    Cout, KH, KW = 8, 3, 3

    key = jax.random.PRNGKey(0)
    kx, kwt = jax.random.split(key)
    x = jax.random.normal(kx, (N, Cin, H, W), dtype=jnp.float32)
    fan_in = Cin * KH * KW
    weight = jax.random.normal(kwt, (Cout, Cin, KH, KW), dtype=jnp.float32) * (2.0 / fan_in) ** 0.5

    out = conv2d_leakyrelu(x, weight, stride=1, negative_slope=0.01)
    out = jax.block_until_ready(out)
    assert out.shape == (N, Cout, H - KH + 1, W - KW + 1), out.shape

    # Reference on the same bf16-rounded operands (kernel computes bf16 x bf16 -> f32),
    # isolating kernel correctness from bf16 input rounding.
    xb = x.astype(jnp.bfloat16).astype(jnp.float32)
    wb = weight.astype(jnp.bfloat16).astype(jnp.float32)
    ref = jax.lax.conv_general_dilated(
        xb, wb, window_strides=(1, 1), padding="VALID",
        dimension_numbers=("NCHW", "OIHW", "NCHW"))
    ref = jnp.where(ref > 0, ref, 0.01 * ref)
    assert jnp.allclose(out, ref, rtol=2e-3, atol=2e-3), float(jnp.max(jnp.abs(out - ref)))

    # Loose sanity check against the full-f32 reference.
    ref32 = jax.lax.conv_general_dilated(
        x, weight, window_strides=(1, 1), padding="VALID",
        dimension_numbers=("NCHW", "OIHW", "NCHW"))
    ref32 = jnp.where(ref32 > 0, ref32, 0.01 * ref32)
    assert jnp.allclose(out, ref32, rtol=5e-2, atol=5e-2)

    print("KERNEL_OK")
</pallas_src>

<mosaic_0001>
module attributes {stable_mosaic.version = 11 : i64} {
  func.func @_conv_implicit_gemm_kernel(%arg0: i32, %arg1: memref<9x8x4xbf16, #tpu.memory_space<vmem>>, %arg2: memref<1x4x290xbf16, #tpu.memory_space<vmem>>, %arg3: memref<1x8x256xf32, #tpu.memory_space<vmem>>, %arg4: memref<8x256xf32, #tpu.memory_space<vmem>>) attributes {dimension_semantics = [#tpu.dimension_semantics<parallel>], iteration_bounds = array<i64: 2>, scalar_prefetch = 0 : i64, scratch_operands = 1 : i64, tpu.core_type = #tpu.core_type<tc>, window_params = [{pipeline_mode = #tpu.pipeline_mode<synchronous>, transform_indices = @transform_0, window_bounds = array<i64: 9, 8, 4>}, {transform_indices = @transform_1, window_bounds = array<i64: 1, 4, 290>}, {transform_indices = @transform_2, window_bounds = array<i64: 1, 8, 256>}]} {
    %c0 = arith.constant 0 : index
    %c0_0 = arith.constant 0 : index
    %c0_1 = arith.constant 0 : index
    %0 = vector.load %arg2[%c0, %c0_0, %c0_1] : memref<1x4x290xbf16, #tpu.memory_space<vmem>>, vector<1x4x290xbf16>
    %1 = vector.shape_cast %0 : vector<1x4x290xbf16> to vector<4x290xbf16>
    %cst = arith.constant 0.000000e+00 : f32
    %2 = vector.broadcast %cst : f32 to vector<8x256xf32>
    %c0_2 = arith.constant 0 : index
    %c0_3 = arith.constant 0 : index
    %3 = vector.load %arg4[%c0_2, %c0_3] : memref<8x256xf32, #tpu.memory_space<vmem>>, vector<8x256xf32>
    tpu.vector_store %arg4[%c0_2, %c0_3], %2 {strides = array<i32>} : memref<8x256xf32, #tpu.memory_space<vmem>>, vector<8x256xf32>,
    %4 = vector.extract_strided_slice %1 {offsets = [0, 0], sizes = [4, 256], strides = [1, 1]} : vector<4x290xbf16> to vector<4x256xbf16>
    %c0_4 = arith.constant 0 : index
    %c0_5 = arith.constant 0 : index
    %5 = vector.load %arg4[%c0_4, %c0_5] : memref<8x256xf32, #tpu.memory_space<vmem>>, vector<8x256xf32>
    %c0_6 = arith.constant 0 : index
    %c0_7 = arith.constant 0 : index
    %c0_8 = arith.constant 0 : index
    %6 = vector.load %arg1[%c0_6, %c0_7, %c0_8] : memref<9x8x4xbf16, #tpu.memory_space<vmem>>, vector<1x8x4xbf16>
    %7 = vector.shape_cast %6 : vector<1x8x4xbf16> to vector<8x4xbf16>
    %cst_9 = arith.constant dense<0.000000e+00> : vector<8x256xf32>
    %8 = tpu.matmul %7, %4, %cst_9 {dimension_numbers = #tpu.dot_dimension_numbers<[1], [0], [0], [1], [0, 0, 1, 1], [], []>} : vector<8x4xbf16>, vector<4x256xbf16>, vector<8x256xf32> -> vector<8x256xf32>
    %9 = arith.addf %5, %8 : vector<8x256xf32>
    %c0_10 = arith.constant 0 : index
    %c0_11 = arith.constant 0 : index
    %10 = vector.load %arg4[%c0_10, %c0_11] : memref<8x256xf32, #tpu.memory_space<vmem>>, vector<8x256xf32>
    tpu.vector_store %arg4[%c0_10, %c0_11], %9 {strides = array<i32>} : memref<8x256xf32, #tpu.memory_space<vmem>>, vector<8x256xf32>,
    %11 = vector.extract_strided_slice %1 {offsets = [0, 1], sizes = [4, 256], strides = [1, 1]} : vector<4x290xbf16> to vector<4x256xbf16>
    %c0_12 = arith.constant 0 : index
    %c0_13 = arith.constant 0 : index
    %12 = vector.load %arg4[%c0_12, %c0_13] : memref<8x256xf32, #tpu.memory_space<vmem>>, vector<8x256xf32>
    %c1 = arith.constant 1 : index
    %c0_14 = arith.constant 0 : index
    %c0_15 = arith.constant 0 : index
    %13 = vector.load %arg1[%c1, %c0_14, %c0_15] : memref<9x8x4xbf16, #tpu.memory_space<vmem>>, vector<1x8x4xbf16>
    %14 = vector.shape_cast %13 : vector<1x8x4xbf16> to vector<8x4xbf16>
    %cst_16 = arith.constant dense<0.000000e+00> : vector<8x256xf32>
    %15 = tpu.matmul %14, %11, %cst_16 {dimension_numbers = #tpu.dot_dimension_numbers<[1], [0], [0], [1], [0, 0, 1, 1], [], []>} : vector<8x4xbf16>, vector<4x256xbf16>, vector<8x256xf32> -> vector<8x256xf32>
    %16 = arith.addf %12, %15 : vector<8x256xf32>
    %c0_17 = arith.constant 0 : index
    %c0_18 = arith.constant 0 : index
    %17 = vector.load %arg4[%c0_17, %c0_18] : memref<8x256xf32, #tpu.memory_space<vmem>>, vector<8x256xf32>
    tpu.vector_store %arg4[%c0_17, %c0_18], %16 {strides = array<i32>} : memref<8x256xf32, #tpu.memory_space<vmem>>, vector<8x256xf32>,
    %18 = vector.extract_strided_slice %1 {offsets = [0, 2], sizes = [4, 256], strides = [1, 1]} : vector<4x290xbf16> to vector<4x256xbf16>
    %c0_19 = arith.constant 0 : index
    %c0_20 = arith.constant 0 : index
    %19 = vector.load %arg4[%c0_19, %c0_20] : memref<8x256xf32, #tpu.memory_space<vmem>>, vector<8x256xf32>
    %c2 = arith.constant 2 : index
    %c0_21 = arith.constant 0 : index
    %c0_22 = arith.constant 0 : index
    %20 = vector.load %arg1[%c2, %c0_21, %c0_22] : memref<9x8x4xbf16, #tpu.memory_space<vmem>>, vector<1x8x4xbf16>
    %21 = vector.shape_cast %20 : vector<1x8x4xbf16> to vector<8x4xbf16>
    %cst_23 = arith.constant dense<0.000000e+00> : vector<8x256xf32>
    %22 = tpu.matmul %21, %18, %cst_23 {dimension_numbers = #tpu.dot_dimension_numbers<[1], [0], [0], [1], [0, 0, 1, 1], [], []>} : vector<8x4xbf16>, vector<4x256xbf16>, vector<8x256xf32> -> vector<8x256xf32>
    %23 = arith.addf %19, %22 : vector<8x256xf32>
    %c0_24 = arith.constant 0 : index
    %c0_25 = arith.constant 0 : index
    %24 = vector.load %arg4[%c0_24, %c0_25] : memref<8x256xf32, #tpu.memory_space<vmem>>, vector<8x256xf32>
    tpu.vector_store %arg4[%c0_24, %c0_25], %23 {strides = array<i32>} : memref<8x256xf32, #tpu.memory_space<vmem>>, vector<8x256xf32>,
    %25 = vector.extract_strided_slice %1 {offsets = [0, 16], sizes = [4, 256], strides = [1, 1]} : vector<4x290xbf16> to vector<4x256xbf16>
    %c0_26 = arith.constant 0 : index
    %c0_27 = arith.constant 0 : index
    %26 = vector.load %arg4[%c0_26, %c0_27] : memref<8x256xf32, #tpu.memory_space<vmem>>, vector<8x256xf32>
    %c3 = arith.constant 3 : index
    %c0_28 = arith.constant 0 : index
    %c0_29 = arith.constant 0 : index
    %27 = vector.load %arg1[%c3, %c0_28, %c0_29] : memref<9x8x4xbf16, #tpu.memory_space<vmem>>, vector<1x8x4xbf16>
    %28 = vector.shape_cast %27 : vector<1x8x4xbf16> to vector<8x4xbf16>
    %cst_30 = arith.constant dense<0.000000e+00> : vector<8x256xf32>
    %29 = tpu.matmul %28, %25, %cst_30 {dimension_numbers = #tpu.dot_dimension_numbers<[1], [0], [0], [1], [0, 0, 1, 1], [], []>} : vector<8x4xbf16>, vector<4x256xbf16>, vector<8x256xf32> -> vector<8x256xf32>
    %30 = arith.addf %26, %29 : vector<8x256xf32>
    %c0_31 = arith.constant 0 : index
    %c0_32 = arith.constant 0 : index
    %31 = vector.load %arg4[%c0_31, %c0_32] : memref<8x256xf32, #tpu.memory_space<vmem>>, vector<8x256xf32>
    tpu.vector_store %arg4[%c0_31, %c0_32], %30 {strides = array<i32>} : memref<8x256xf32, #tpu.memory_space<vmem>>, vector<8x256xf32>,
    %32 = vector.extract_strided_slice %1 {offsets = [0, 17], sizes = [4, 256], strides = [1, 1]} : vector<4x290xbf16> to vector<4x256xbf16>
    %c0_33 = arith.constant 0 : index
    %c0_34 = arith.constant 0 : index
    %33 = vector.load %arg4[%c0_33, %c0_34] : memref<8x256xf32, #tpu.memory_space<vmem>>, vector<8x256xf32>
    %c4 = arith.constant 4 : index
    %c0_35 = arith.constant 0 : index
    %c0_36 = arith.constant 0 : index
    %34 = vector.load %arg1[%c4, %c0_35, %c0_36] : memref<9x8x4xbf16, #tpu.memory_space<vmem>>, vector<1x8x4xbf16>
    %35 = vector.shape_cast %34 : vector<1x8x4xbf16> to vector<8x4xbf16>
    %cst_37 = arith.constant dense<0.000000e+00> : vector<8x256xf32>
    %36 = tpu.matmul %35, %32, %cst_37 {dimension_numbers = #tpu.dot_dimension_numbers<[1], [0], [0], [1], [0, 0, 1, 1], [], []>} : vector<8x4xbf16>, vector<4x256xbf16>, vector<8x256xf32> -> vector<8x256xf32>
    %37 = arith.addf %33, %36 : vector<8x256xf32>
    %c0_38 = arith.constant 0 : index
    %c0_39 = arith.constant 0 : index
    %38 = vector.load %arg4[%c0_38, %c0_39] : memref<8x256xf32, #tpu.memory_space<vmem>>, vector<8x256xf32>
    tpu.vector_store %arg4[%c0_38, %c0_39], %37 {strides = array<i32>} : memref<8x256xf32, #tpu.memory_space<vmem>>, vector<8x256xf32>,
    %39 = vector.extract_strided_slice %1 {offsets = [0, 18], sizes = [4, 256], strides = [1, 1]} : vector<4x290xbf16> to vector<4x256xbf16>
    %c0_40 = arith.constant 0 : index
    %c0_41 = arith.constant 0 : index
    %40 = vector.load %arg4[%c0_40, %c0_41] : memref<8x256xf32, #tpu.memory_space<vmem>>, vector<8x256xf32>
    %c5 = arith.constant 5 : index
    %c0_42 = arith.constant 0 : index
    %c0_43 = arith.constant 0 : index
    %41 = vector.load %arg1[%c5, %c0_42, %c0_43] : memref<9x8x4xbf16, #tpu.memory_space<vmem>>, vector<1x8x4xbf16>
    %42 = vector.shape_cast %41 : vector<1x8x4xbf16> to vector<8x4xbf16>
    %cst_44 = arith.constant dense<0.000000e+00> : vector<8x256xf32>
    %43 = tpu.matmul %42, %39, %cst_44 {dimension_numbers = #tpu.dot_dimension_numbers<[1], [0], [0], [1], [0, 0, 1, 1], [], []>} : vector<8x4xbf16>, vector<4x256xbf16>, vector<8x256xf32> -> vector<8x256xf32>
    %44 = arith.addf %40, %43 : vector<8x256xf32>
    %c0_45 = arith.constant 0 : index
    %c0_46 = arith.constant 0 : index
    %45 = vector.load %arg4[%c0_45, %c0_46] : memref<8x256xf32, #tpu.memory_space<vmem>>, vector<8x256xf32>
    tpu.vector_store %arg4[%c0_45, %c0_46], %44 {strides = array<i32>} : memref<8x256xf32, #tpu.memory_space<vmem>>, vector<8x256xf32>,
    %46 = vector.extract_strided_slice %1 {offsets = [0, 32], sizes = [4, 256], strides = [1, 1]} : vector<4x290xbf16> to vector<4x256xbf16>
    %c0_47 = arith.constant 0 : index
    %c0_48 = arith.constant 0 : index
    %47 = vector.load %arg4[%c0_47, %c0_48] : memref<8x256xf32, #tpu.memory_space<vmem>>, vector<8x256xf32>
    %c6 = arith.constant 6 : index
    %c0_49 = arith.constant 0 : index
    %c0_50 = arith.constant 0 : index
    %48 = vector.load %arg1[%c6, %c0_49, %c0_50] : memref<9x8x4xbf16, #tpu.memory_space<vmem>>, vector<1x8x4xbf16>
    %49 = vector.shape_cast %48 : vector<1x8x4xbf16> to vector<8x4xbf16>
    %cst_51 = arith.constant dense<0.000000e+00> : vector<8x256xf32>
    %50 = tpu.matmul %49, %46, %cst_51 {dimension_numbers = #tpu.dot_dimension_numbers<[1], [0], [0], [1], [0, 0, 1, 1], [], []>} : vector<8x4xbf16>, vector<4x256xbf16>, vector<8x256xf32> -> vector<8x256xf32>
    %51 = arith.addf %47, %50 : vector<8x256xf32>
    %c0_52 = arith.constant 0 : index
    %c0_53 = arith.constant 0 : index
    %52 = vector.load %arg4[%c0_52, %c0_53] : memref<8x256xf32, #tpu.memory_space<vmem>>, vector<8x256xf32>
    tpu.vector_store %arg4[%c0_52, %c0_53], %51 {strides = array<i32>} : memref<8x256xf32, #tpu.memory_space<vmem>>, vector<8x256xf32>,
    %53 = vector.extract_strided_slice %1 {offsets = [0, 33], sizes = [4, 256], strides = [1, 1]} : vector<4x290xbf16> to vector<4x256xbf16>
    %c0_54 = arith.constant 0 : index
    %c0_55 = arith.constant 0 : index
    %54 = vector.load %arg4[%c0_54, %c0_55] : memref<8x256xf32, #tpu.memory_space<vmem>>, vector<8x256xf32>
    %c7 = arith.constant 7 : index
    %c0_56 = arith.constant 0 : index
    %c0_57 = arith.constant 0 : index
    %55 = vector.load %arg1[%c7, %c0_56, %c0_57] : memref<9x8x4xbf16, #tpu.memory_space<vmem>>, vector<1x8x4xbf16>
    %56 = vector.shape_cast %55 : vector<1x8x4xbf16> to vector<8x4xbf16>
    %cst_58 = arith.constant dense<0.000000e+00> : vector<8x256xf32>
    %57 = tpu.matmul %56, %53, %cst_58 {dimension_numbers = #tpu.dot_dimension_numbers<[1], [0], [0], [1], [0, 0, 1, 1], [], []>} : vector<8x4xbf16>, vector<4x256xbf16>, vector<8x256xf32> -> vector<8x256xf32>
    %58 = arith.addf %54, %57 : vector<8x256xf32>
    %c0_59 = arith.constant 0 : index
    %c0_60 = arith.constant 0 : index
    %59 = vector.load %arg4[%c0_59, %c0_60] : memref<8x256xf32, #tpu.memory_space<vmem>>, vector<8x256xf32>
    tpu.vector_store %arg4[%c0_59, %c0_60], %58 {strides = array<i32>} : memref<8x256xf32, #tpu.memory_space<vmem>>, vector<8x256xf32>,
    %60 = vector.extract_strided_slice %1 {offsets = [0, 34], sizes = [4, 256], strides = [1, 1]} : vector<4x290xbf16> to vector<4x256xbf16>
    %c0_61 = arith.constant 0 : index
    %c0_62 = arith.constant 0 : index
    %61 = vector.load %arg4[%c0_61, %c0_62] : memref<8x256xf32, #tpu.memory_space<vmem>>, vector<8x256xf32>
    %c8 = arith.constant 8 : index
    %c0_63 = arith.constant 0 : index
    %c0_64 = arith.constant 0 : index
    %62 = vector.load %arg1[%c8, %c0_63, %c0_64] : memref<9x8x4xbf16, #tpu.memory_space<vmem>>, vector<1x8x4xbf16>
    %63 = vector.shape_cast %62 : vector<1x8x4xbf16> to vector<8x4xbf16>
    %cst_65 = arith.constant dense<0.000000e+00> : vector<8x256xf32>
    %64 = tpu.matmul %63, %60, %cst_65 {dimension_numbers = #tpu.dot_dimension_numbers<[1], [0], [0], [1], [0, 0, 1, 1], [], []>} : vector<8x4xbf16>, vector<4x256xbf16>, vector<8x256xf32> -> vector<8x256xf32>
    %65 = arith.addf %61, %64 : vector<8x256xf32>
    %c0_66 = arith.constant 0 : index
    %c0_67 = arith.constant 0 : index
    %66 = vector.load %arg4[%c0_66, %c0_67] : memref<8x256xf32, #tpu.memory_space<vmem>>, vector<8x256xf32>
    tpu.vector_store %arg4[%c0_66, %c0_67], %65 {strides = array<i32>} : memref<8x256xf32, #tpu.memory_space<vmem>>, vector<8x256xf32>,
    %c0_68 = arith.constant 0 : index
    %c0_69 = arith.constant 0 : index
    %67 = vector.load %arg4[%c0_68, %c0_69] : memref<8x256xf32, #tpu.memory_space<vmem>>, vector<8x256xf32>
    %cst_70 = arith.constant 0.000000e+00 : f32
    %68 = vector.broadcast %cst_70 : f32 to vector<8x256xf32>
    %69 = arith.cmpf ogt, %67, %68 : vector<8x256xf32>
    %cst_71 = arith.constant 0.00999999977 : f32
    %70 = vector.broadcast %cst_71 : f32 to vector<8x256xf32>
    %71 = arith.mulf %70, %67 : vector<8x256xf32>
    %72 = arith.select %69, %67, %71 : vector<8x256xi1>, vector<8x256xf32>
    %c0_72 = arith.constant 0 : index
    %c0_73 = arith.constant 0 : index
    %c0_74 = arith.constant 0 : index
    %73 = vector.load %arg3[%c0_72, %c0_73, %c0_74] : memref<1x8x256xf32, #tpu.memory_space<vmem>>, vector<1x8x256xf32>
    %74 = vector.shape_cast %73 : vector<1x8x256xf32> to vector<8x256xf32>
    %75 = vector.shape_cast %72 : vector<8x256xf32> to vector<1x8x256xf32>
    tpu.vector_store %arg3[%c0_72, %c0_73, %c0_74], %75 {strides = array<i32>} : memref<1x8x256xf32, #tpu.memory_space<vmem>>, vector<1x8x256xf32>,
    return
  }
  func.func @transform_0(%arg0: i32) -> (i32, i32, i32) {
    %c0_i32 = arith.constant 0 : i32
    %c0_i32_0 = arith.constant 0 : i32
    %c0_i32_1 = arith.constant 0 : i32
    %c0_i32_2 = arith.constant 0 : i32
    return %c0_i32, %c0_i32_0, %c0_i32_1 : i32, i32, i32
  }
  func.func @transform_1(%arg0: i32) -> (i32, i32, i32) {
    %c0_i32 = arith.constant 0 : i32
    %c0_i32_0 = arith.constant 0 : i32
    %c0_i32_1 = arith.constant 0 : i32
    return %arg0, %c0_i32, %c0_i32_0 : i32, i32, i32
  }
  func.func @transform_2(%arg0: i32) -> (i32, i32, i32) {
    %c0_i32 = arith.constant 0 : i32
    %c0_i32_0 = arith.constant 0 : i32
    %c0_i32_1 = arith.constant 0 : i32
    return %arg0, %c0_i32, %c0_i32_0 : i32, i32, i32
  }
}

</mosaic_0001>

<bundles_post_ra>
// kernel: tpu_custom_call.1
= control target key start
LH: loop header
LB: loop body
LE: loop exit
PB: predicated region body
PF: predicated region fallthrough
CT: control target
= control target key end

     0   :  { %7 = vsyncpa [#allocation4], 0  ;;  %s1214_s0 = inlined_call_operand.vmem [shape: bf16[9,8,4], index: 0, kind: input, shape index: {}]   ;;  %s1215_s1 = inlined_call_operand.vmem [shape: bf16[2,4,290], index: 1, kind: input, shape index: {}]   ;;  %s1216_s2 = inlined_call_operand.hbm [shape: f32[2,8,256], index: 2, kind: output, shape index: {}]  }
   0x1   :  { %9 = vsyncpa [#allocation4 + $0x1], 0  ;;  %s1051_s9 = smov 0   ;;  %s1053_s10 = smov 0  }
   0x2   :  { %s1055_s11 = smov 0   ;;  %s1057_s12 = smov 0  }
   0x3 LB: > { %s1072_s13 = sadd.s32 4294967295, %s1023_s12   ;;  %s842_s14 = sadd.s32 4294967294, %s1023_s12   ;;  %s1023_s12 = sphi %s1057_s12, %s1222_s12   ;;  %s1019_s11 = sphi %s1055_s11, %s1221_s11   ;;  %s1015_s10 = sphi %s1053_s10, %s1220_s10   ;;  %s1011_s9 = sphi %s1051_s9, %s1219_s9  }
   0x4   : > { %s1076_s15 = sadd.s32 1, %s1023_s12   ;;  %s69_s16 = sadd.s32 1, %s1019_s11 }
   0x5   : > { %s66_s17 = ssub.s32 %s1023_s12, %s1076_s15  ;;  %p79_p0 = scmp.ne.s32.totalorder %s1019_s11, %s1015_s10 }
   0x6   : > { %p67_p1 = scmp.eq.s32.totalorder %s66_s17, 0  ;;  %p80_p2 = scmp.eq.s32.totalorder %s1072_s13, 1 }
   0x7   : > { %p85_p3 = scmp.ne.s32.totalorder %s1015_s10, %s1011_s9  ;;  %p86_p4 = scmp.eq.s32.totalorder %s842_s14, 1 }
   0x8   : > { %s1087_s18 = scalar_select %p67_p1, %s1019_s11, %s69_s16  }
   0x9   : > { %p1089_p5 = por %p80_p2, %p79_p0  ;;  %p1093_p6 = por %p86_p4, %p85_p3 }
   0xa   : > { %p845_p7 = scmp.ge.s32.totalorder %s1023_s12, 1  ;;  %p115_p8 = scmp.lt.s32.totalorder %s1023_s12, 3 }
   0xc   : > { %p116_p9 = pnand %p845_p7, %p115_p8 }
   0xd   : > { %p137_p10 = scmp.lt.s32.totalorder (!%p116_p9), %s1072_s13, 1  ;;  %v153_v0 = vlaneseq (!%p116_p9)  ;;  %v1025_v1 = vmov (!%p116_p9), 1983009808   ;;  %v1026_v6 = vmov (!%p116_p9), 0   ;;  %vm162_vm0 = vcmask (!%p116_p9), 1041408   ;;  %s1027_s26 = smov (!%p116_p9), 111  }
   0xe   : > { %119 = sbr.rel (%p116_p9) target bundleno = 433 (0x1b1), region = 28  ;;  %v151_v2 = vunpack.c.l.s4 (!%p116_p9), %v1025_v1  ;;  %201 = vmatprep.mubr.bf16.mxu1 (!%p116_p9), %v1026_v6  ;;  %477 = vmatprep.mubr.bf16.mxu0 (!%p116_p9), %v1026_v6  ;;  %v148_v13 = vld [vmem:[%s1214_s0] sm:$0xf] (!%p116_p9)  ;;  %vm158_vm1 = vcmask (!%p116_p9), 31744   ;;  %s1028_s29 = smov (!%p116_p9), 110   ;;  %vm433_vm2 = vcmask (!%p116_p9), 908288  }
   0xf   : > { %v154_v3 = vshrl.u32 (!%p116_p9), %v153_v0, 7  ;;  %s1029_s30 = smov (!%p116_p9), 127   ;;  %s1030_s3 = smov (!%p116_p9), 96   ;;  %vm500_vm3 = vcmask (!%p116_p9), 900096   ;;  %v859_v21 = vld [vmem:[%s1214_s0 + $0x10] sm:$0xf] (!%p116_p9) }
  0x10   : > { %v152_v4 = vunpack.c.0.s8 (!%p116_p9), %v151_v2  ;;  %s1031_s4 = smov (!%p116_p9), 126   ;;  %s1032_s5 = smov (!%p116_p9), 95   ;;  %vm232_vm4 = vcmask (!%p116_p9), 1039360   ;;  %vm567_vm5 = vcmask (!%p116_p9), 785408   ;;  %v850_v34 = vld [vmem:[%s1214_s0 + $0x4] sm:$0xf] (!%p116_p9) }
  0x11   : > { %s1033_s6 = smov (!%p116_p9), 112   ;;  %s1034_s7 = smov (!%p116_p9), 94   ;;  %v862_v35 = vld [vmem:[%s1214_s0 + $0x14] sm:$0xf] (!%p116_p9)  ;;  %vm299_vm6 = vcmask (!%p116_p9), 1031168   ;;  %vm634_vm7 = vcmask (!%p116_p9), 777216  }
  0x12   : > { %v155_v5 = vsub.s32 (!%p116_p9), %v152_v4, %v154_v3  ;;  %v853_v48 = vld [vmem:[%s1214_s0 + $0x8] sm:$0xf] (!%p116_p9)  ;;  %v865_v49 = vld [vmem:[%s1214_s0 + $0x18] sm:$0xf] (!%p116_p9)  ;;  %vm366_vm8 = vcmask (!%p116_p9), 916480   ;;  %vm701_vm9 = vcmask (!%p116_p9), 769024  }
  0x13   : > { %v856_v62 = vld [vmem:[%s1214_s0 + $0xc] sm:$0xf] (!%p116_p9)  ;;  %v868_v63 = vld [vmem:[%s1214_s0 + $0x1c] sm:$0xf] (!%p116_p9)  ;;  %s1035_s23 = smov (!%p116_p9), [#allocation3]  }
  0x14   : > { %s965_s24 = sshll.u32 (!%p116_p9), %s1035_s23, 4  ;;  %s966_s24 = int_to_ptr.vmem [resolvable:$false] %s965_s24 }
  0x15   : > { %s138_s21 = scalar_select %p137_p10, %s1072_s13, 1 }
  0x17   : > { %s910_s22 = smul.u32 6, %s138_s21 }
  0x19   : > { %s141_s25 = scalar_lea.vmem %s1215_s1, %s910_s22 }
  0x1a   : > { %v143_v7 = vld [vmem:[%s141_s25] sm:$0x3f]  ;;  %s967_s25 = scalar_lea.vmem %s966_s24, 512 }
  0x1b   : > { %v156_v8 = vrot.slane %v143_v7, %v155_v5  ;;  %v218_v9 = vcombine.high %v143_v7, %v143_v7 }
  0x1d   : > { %427 = vrot.lane.b32.xlu0 %v156_v8, %s1027_s26  ;;  %v225_v10 = vrot.slane %v218_v9, %v155_v5  ;;  %v157_v11 = vcombine.high %v156_v8, %v156_v8  ;;  %v164_v12 = vsel %vm162_vm0, %v156_v8, 0  ;;  %v871_v5 = vld [vmem:[%s1214_s0 + $0x20] sm:$0xf] }
  0x1f   : > { %431 = vrot.lane.b32.xlu1 %v225_v10, %s1027_s26  ;;  %848 = vmatprep.subr.msk.bf16.mxu1 %vm162_vm0, %v157_v11 }
  0x20   : > { %170 = vmatpush1.bf16.msra.mxu1 %v164_v12 }
  0x21   : > { %429 = vrot.lane.b32.xlu0 %v157_v11, %s1027_s26 }
  0x23   : > { %494 = vrot.lane.b32.xlu1 %v156_v8, %s1028_s29  ;;  %849 = vmatmul.mubr.msk.bf16.vlgmr.msra.gmra.mrb[0].mxu1 %vm158_vm1, %v148_v13 }
  0x24   : > { %276 = vmatprep.mubr.bf16.mxu1 %v1026_v6 }
  0x25   : > { %496 = vrot.lane.b32.xlu0 %v157_v11, %s1028_s29 }
  0x27   : > { %498 = vrot.lane.b32.xlu1 %v225_v10, %s1028_s29 }
  0x29   : > { %226 = vrot.lane.b32.xlu0 %v156_v8, %s1029_s30 }
  0x2b   : > { %228 = vrot.lane.b32.xlu1 %v157_v11, %s1029_s30 }
  0x2d   : > { %230 = vrot.lane.b32.xlu0 %v225_v10, %s1029_s30 }
  0x2f   : > { %561 = vrot.lane.b32.xlu1 %v156_v8, %s1030_s3 }
  0x31   : > { %563 = vrot.lane.b32.xlu0 %v157_v11, %s1030_s3 }
  0x33   : > { %565 = vrot.lane.b32.xlu1 %v225_v10, %s1030_s3 }
  0x35   : > { %293 = vrot.lane.b32.xlu0 %v156_v8, %s1031_s4 }
  0x37   : > { %295 = vrot.lane.b32.xlu1 %v157_v11, %s1031_s4 }
  0x39   : > { %297 = vrot.lane.b32.xlu0 %v225_v10, %s1031_s4 }
  0x3b   : > { %628 = vrot.lane.b32.xlu1 %v156_v8, %s1032_s5 }
  0x3d   : > { %630 = vrot.lane.b32.xlu0 %v157_v11, %s1032_s5 }
  0x3f   : > { %632 = vrot.lane.b32.xlu1 %v225_v10, %s1032_s5  ;;  %s134_s5 = sand.u32 1, %s1015_s10  }
  0x41   : > { %360 = vrot.lane.b32.xlu0 %v156_v8, %s1033_s6 }
  0x43   : > { %362 = vrot.lane.b32.xlu1 %v157_v11, %s1033_s6 }
  0x45   : > { %364 = vrot.lane.b32.xlu0 %v225_v10, %s1033_s6  ;;  %s846_s6 = sshll.u32 %s134_s5, 4 }
  0x46   : > { %s136_s8 = scalar_lea.vmem [#allocation3], %s846_s6 }
  0x47   : > { %695 = vrot.lane.b32.xlu1 %v156_v8, %s1034_s7  ;;  %s783_s14 = sshll.u32 %s136_s8, 4  ;;  %s1174_s14 = int_to_ptr.vmem [resolvable:$true] %s783_s14 }
  0x48   : > { %s961_s22 = scalar_lea.vmem %s1174_s14, 256  ;;  %p968_p0 = scmp.lt.s32.totalorder %s1174_s14, %s966_s24 }
  0x49   : > { %697 = vrot.lane.b32.xlu0 %v157_v11, %s1034_s7  ;;  %p962_p11 = scmp.ne.s32.totalorder %s1174_s14, %s961_s22  ;;  %p969_p1 = scmp.lt.s32.totalorder %s967_s25, %s961_s22 }
  0x4b   : > { %699 = vrot.lane.b32.xlu1 %v225_v10, %s1034_s7  ;;  %s879_s7 = sshll.u32 %s1072_s13, 8  ;;  %s769_s13 = scalar_lea.sflag [#allocation4], %s134_s5 }
  0x4c   : > { %s1172_s21 = scalar_lea.hbm %s1216_s2, %s879_s7  ;;  %p963_p12 = pnand %p962_p11, %p1089_p5 }
  0x4d   : > { %p970_p2 = por %p969_p1, %p968_p0 }
  0x4e   : > { %p964_p13 = pneg %p963_p12 }
  0x50   : > { %p971_p3 = pnand %p970_p2, %p964_p13 }
  0x8f   : > { %v428_v14 = vpop.permute.xlu0 %427 }
  0x91   : > { %v432_v15 = vpop.permute.xlu1 %431 }
  0x93   : > { %v430_v16 = vpop.permute.xlu0 %429 }
  0x94   : > { %v435_v17 = vsel %vm433_vm2, %v430_v16, %v432_v15  ;;  %v434_v18 = vsel %vm433_vm2, %v428_v14, %v430_v16 }
  0x95   : > { %v495_v19 = vpop.permute.xlu1 %494  ;;  %860 = vmatprep.subr.msk.bf16.mxu0 %vm162_vm0, %v435_v17  ;;  %v440_v20 = vsel %vm162_vm0, %v434_v18, 0 }
  0x96   : > { %446 = vmatpush1.bf16.msra.mxu0 %v440_v20 }
  0x97   : > { %v497_v22 = vpop.permute.xlu0 %496 }
  0x98   : > { %v501_v23 = vsel %vm500_vm3, %v495_v19, %v497_v22 }
  0x99   : > { %v507_v24 = vsel %vm162_vm0, %v501_v23, 0  ;;  %v499_v25 = vpop.permute.xlu1 %498  ;;  %861 = vmatmul.mubr.msk.bf16.vlgmr.msra.gmra.mrb[0].mxu0 %vm158_vm1, %v859_v21 }
  0x9a   : > { %v502_v26 = vsel %vm500_vm3, %v497_v22, %v499_v25  ;;  %544 = vmatprep.mubr.bf16.mxu0 %v1026_v6 }
  0x9b   : > { %863 = vmatprep.subr.msk.bf16.mxu0 %vm162_vm0, %v502_v26  ;;  %v227_v27 = vpop.permute.xlu0 %226 }
  0x9c   : > { %513 = vmatpush1.bf16.msra.mxu0 %v507_v24 }
  0x9d   : > { %v229_v28 = vpop.permute.xlu1 %228 }
  0x9e   : > { %v233_v29 = vsel %vm232_vm4, %v227_v27, %v229_v28 }
  0x9f   : > { %v239_v30 = vsel %vm162_vm0, %v233_v29, 0  ;;  %v231_v31 = vpop.permute.xlu0 %230 }
  0xa0   : > { %v234_v32 = vsel %vm232_vm4, %v229_v28, %v231_v31 }
  0xa1   : > { %v562_v33 = vpop.permute.xlu1 %561  ;;  %851 = vmatprep.subr.msk.bf16.mxu1 %vm162_vm0, %v234_v32 }
  0xa2   : > { %245 = vmatpush1.bf16.msra.mxu1 %v239_v30 }
  0xa3   : > { %v564_v36 = vpop.permute.xlu0 %563 }
  0xa4   : > { %v568_v37 = vsel %vm567_vm5, %v562_v33, %v564_v36 }
  0xa5   : > { %v574_v38 = vsel %vm162_vm0, %v568_v37, 0  ;;  %v566_v39 = vpop.permute.xlu1 %565  ;;  %852 = vmatmul.mubr.msk.bf16.vlgmr.msra.gmra.mrb[0].mxu1 %vm158_vm1, %v850_v34  ;;  %864 = vmatmul.mubr.msk.bf16.vlgmr.msra.gmra.mrb[0].mxu0 %vm158_vm1, %v862_v35 }
  0xa6   : > { %v569_v40 = vsel %vm567_vm5, %v564_v36, %v566_v39  ;;  %343 = vmatprep.mubr.bf16.mxu1 %v1026_v6  ;;  %611 = vmatprep.mubr.bf16.mxu0 %v1026_v6 }
  0xa7   : > { %866 = vmatprep.subr.msk.bf16.mxu0 %vm162_vm0, %v569_v40  ;;  %v294_v41 = vpop.permute.xlu0 %293 }
  0xa8   : > { %580 = vmatpush1.bf16.msra.mxu0 %v574_v38 }
  0xa9   : > { %v296_v42 = vpop.permute.xlu1 %295 }
  0xaa   : > { %v300_v43 = vsel %vm299_vm6, %v294_v41, %v296_v42 }
  0xab   : > { %v306_v44 = vsel %vm162_vm0, %v300_v43, 0  ;;  %v298_v45 = vpop.permute.xlu0 %297 }
  0xac   : > { %v301_v46 = vsel %vm299_vm6, %v296_v42, %v298_v45 }
  0xad   : > { %v629_v47 = vpop.permute.xlu1 %628  ;;  %854 = vmatprep.subr.msk.bf16.mxu1 %vm162_vm0, %v301_v46 }
  0xae   : > { %312 = vmatpush1.bf16.msra.mxu1 %v306_v44 }
  0xaf   : > { %v631_v50 = vpop.permute.xlu0 %630 }
  0xb0   : > { %v635_v51 = vsel %vm634_vm7, %v629_v47, %v631_v50 }
  0xb1   : > { %v641_v52 = vsel %vm162_vm0, %v635_v51, 0  ;;  %v633_v53 = vpop.permute.xlu1 %632  ;;  %855 = vmatmul.mubr.msk.bf16.vlgmr.msra.gmra.mrb[0].mxu1 %vm158_vm1, %v853_v48  ;;  %867 = vmatmul.mubr.msk.bf16.vlgmr.msra.gmra.mrb[0].mxu0 %vm158_vm1, %v865_v49 }
  0xb2   : > { %v636_v54 = vsel %vm634_vm7, %v631_v50, %v633_v53  ;;  %410 = vmatprep.mubr.bf16.mxu1 %v1026_v6  ;;  %678 = vmatprep.mubr.bf16.mxu0 %v1026_v6 }
  0xb3   : > { %869 = vmatprep.subr.msk.bf16.mxu0 %vm162_vm0, %v636_v54  ;;  %v361_v55 = vpop.permute.xlu0 %360 }
  0xb4   : > { %647 = vmatpush1.bf16.msra.mxu0 %v641_v52 }
  0xb5   : > { %v363_v56 = vpop.permute.xlu1 %362 }
  0xb6   : > { %v367_v57 = vsel %vm366_vm8, %v361_v55, %v363_v56 }
  0xb7   : > { %v373_v58 = vsel %vm162_vm0, %v367_v57, 0  ;;  %v365_v59 = vpop.permute.xlu0 %364 }
  0xb8   : > { %v368_v60 = vsel %vm366_vm8, %v363_v56, %v365_v59 }
  0xb9   : > { %v696_v61 = vpop.permute.xlu1 %695  ;;  %857 = vmatprep.subr.msk.bf16.mxu1 %vm162_vm0, %v368_v60 }
  0xba   : > { %379 = vmatpush1.bf16.msra.mxu1 %v373_v58 }
  0xbb   : > { %v698_v0 = vpop.permute.xlu0 %697 }
  0xbc   : > { %v702_v1 = vsel %vm701_vm9, %v696_v61, %v698_v0 }
  0xbd   : > { %v708_v2 = vsel %vm162_vm0, %v702_v1, 0  ;;  %v700_v3 = vpop.permute.xlu1 %699  ;;  %858 = vmatmul.mubr.msk.bf16.vlgmr.msra.gmra.mrb[0].mxu1 %vm158_vm1, %v856_v62  ;;  %870 = vmatmul.mubr.msk.bf16.vlgmr.msra.gmra.mrb[0].mxu0 %vm158_vm1, %v868_v63 }
  0xbe   : > { %v703_v4 = vsel %vm701_vm9, %v698_v0, %v700_v3  ;;  %745 = vmatprep.mubr.bf16.mxu0 %v1026_v6 }
  0xbf   : > { %872 = vmatprep.subr.msk.bf16.mxu0 %vm162_vm0, %v703_v4 }
  0xc0   : > { %714 = vmatpush1.bf16.msra.mxu0 %v708_v2 }
  0xc9   : > { %873 = vmatmul.mubr.msk.bf16.vlgmr.msra.gmra.mrb[0].mxu0 %vm158_vm1, %v871_v5 }
 0x190   : > { %v412_v7 = vpop.f32.mrb[0].mxu1 }
 0x191   : > { %v414_v8 = vpop.f32.mrb[1].mxu1 }
 0x192   : > { %v416_v9 = vpop.f32.mrb[2].mxu1 }
 0x193   : > { %v417_v10 = vpop.f32.mrb[3].mxu1 }
 0x19c   : > { %v747_v11 = vpop.f32.mrb[0].mxu0 }
 0x19d   : > { %v880_v12 = vadd.f32 %v747_v11, %v412_v7  ;;  %v749_v13 = vpop.f32.mrb[1].mxu0 }
 0x19e   : > { %v881_v6 = vadd.f32 %v749_v13, %v414_v8  ;;  %v751_v14 = vpop.f32.mrb[2].mxu0 }
 0x19f   : > { %vm760_vm10 = vcmp.gt.f32.partialorder %v880_v12, 0.0  ;;  %v762_v15 = vmul.f32 0.01, %v880_v12  ;;  %v752_v16 = vpop.f32.mrb[3].mxu0 }
 0x1a0   : > { %vm761_vm11 = vcmp.gt.f32.partialorder %v881_v6, 0.0  ;;  %v763_v17 = vmul.f32 0.01, %v881_v6 }
 0x1a1   : > { %v764_v18 = vsel %vm760_vm10, %v880_v12, %v762_v15 }
 0x1a2   : > { %v765_v19 = vsel %vm761_vm11, %v881_v6, %v763_v17  ;;  %766 = vst [vmem:[%s136_s8] sm:$0xff] %v764_v18 }
 0x1a3   : > { %767 = vst [vmem:[%s136_s8 + $0x8] sm:$0xff] %v765_v19 }
 0x1a4   : > { %974 = shalt.err (!%p971_p3)
}
 0x1a5   : > { %s975_s26 = scalar_lea.hbm %s1172_s21, 256  ;;  %s979_s29 = scalar_lea.hbm %s1216_s2, 512 }
 0x1a6   : > { %p976_p4 = scmp.ne.s32.totalorder %s1172_s21, %s975_s26  ;;  %p980_p9 = scmp.lt.u32.totalorder %s1172_s21, %s1216_s2 }
 0x1a7   : > { %p981_p10 = scmp.lt.u32.totalorder %s979_s29, %s975_s26  ;;  %p983_p12 = scmp.lt.u32.totalorder %s975_s26, %s1172_s21 }
 0x1a8   : > { %p977_p7 = pnand %p976_p4, %p1089_p5 }
 0x1a9   : > { %p982_p11 = por %p981_p10, %p980_p9 }
 0x1aa   : > { %p978_p8 = pneg %p977_p7 }
 0x1ab   : > { %p984_p13 = por %p983_p12, %p982_p11 }
 0x1ad   : > { %p985_p0 = pnand %p984_p13, %p978_p8 }
 0x1af   : > { %988 = shalt.err (!%p985_p0)
}
 0x1b0   : > { %911 = dma.vmem_to_hbm [thread:$0]  (%p1089_p5), %s1174_s14, 256, %s1172_s21, %s769_s13  }
 0x1b1 PF: > { %p917_p1 = scmp.ge.s32.totalorder %s1023_s12, 2  ;;  %s795_s4 = sand.u32 1, %s1011_s9  }
 0x1b2   : > { %s796_s5 = scalar_lea.sflag [#allocation4], %s795_s4 }
 0x1b3   : > { %p914_p2 = pnand %p917_p1, %p1093_p6 }
 0x1b5   : > { %1006 = dma.done.wait (!%p914_p2), %s796_s5, 256  }
 0x1b6   : > { %1008 = vsyncadd (!%p914_p2), %s796_s5, 4294967040  ;;  %p12_p3 = scmp.ge.s32.totalorder %s1076_s15, 4   ;;  %s1219_s9 = smov %s1015_s10 }
 0x1b7   : > { %s1220_s10 = smov %s1019_s11  ;;  %s1221_s11 = smov %s1087_s18 }
 0x1b8   : > { %s1222_s12 = smov %s1076_s15  ;;  %14 = sbr.rel (!%p12_p3) target bundleno = 3 (0x3), region = 71 }
 0x1bf   :  { %801 = vsyncpa [#allocation4], 1 }
 0x1c0   :  { %803 = vsyncpa [#allocation4 + $0x1], 1 }

</bundles_post_ra>
